<compile_context>
chip_gen: v7x
topology: tpu7x:2x2x1
jax: 0.10.0
libtpu: 0.0.40
codegen_flags: <defaults>
</compile_context>

<pallas_src>
import functools

import jax
import jax.numpy as jnp
import numpy as np
from jax.experimental import pallas as pl
from jax.experimental.pallas import tpu as pltpu

BASE_CHANNEL = 4  # config.config['latent'] == True -> base_channel = 4


@functools.lru_cache(maxsize=None)
def _bilinear_matrix_np(out_size: int, in_size: int) -> np.ndarray:
    """Interp matrix matching F.interpolate(mode='bilinear', align_corners=False)."""
    scale = in_size / out_size
    o = np.arange(out_size, dtype=np.float64)
    src = np.maximum((o + 0.5) * scale - 0.5, 0.0)
    i0 = np.minimum(np.floor(src).astype(np.int64), in_size - 1)
    i1 = np.minimum(i0 + 1, in_size - 1)
    frac = src - i0
    m = np.zeros((out_size, in_size), np.float64)
    rows = np.arange(out_size)
    m[rows, i0] += 1.0 - frac
    m[rows, i1] += frac
    return m.astype(np.float32)


@functools.lru_cache(maxsize=None)
def _kron_interp_t(h: int, w: int, hc: int, wc: int):
    """K^T with K = kron(Wh, Ww); up_flat = xc_flat @ K^T.  Shape (hc*wc, h*w)."""
    wh = _bilinear_matrix_np(h, hc)          # (h, hc)
    ww = _bilinear_matrix_np(w, wc)          # (w, wc)
    return jnp.asarray(np.kron(wh, ww).T)    # (hc*wc, h*w)


def _ssr_fused_kernel(wcond_ref, wx_ref, bias_ref,   # SMEM: (c,c), (c,c), (c,)
                      kt_ref,                        # VMEM resident: (hwc, hw)
                      x_ref, xc_ref,                 # VMEM: (nb, c*hw), (nb, c*hwc)
                      o_ref,                         # VMEM: (nb, c*hw)
                      *, c, hw, hwc):
    x = x_ref[...]                                   # (nb, c*hw)   lane-dense
    xc = xc_ref[...]                                 # (nb, c*hwc)  lane-dense
    kt = kt_ref[...]                                 # (hwc, hw)

    for co in range(c):
        # --- conditioning channel mix at LOW resolution (cheap VPU FMAs) ---
        m = xc[:, 0:hwc] * wcond_ref[co, 0]
        for ci in range(1, c):
            m = m + xc[:, ci * hwc:(ci + 1) * hwc] * wcond_ref[co, ci]
        # --- bilinear up-sample: one MXU matmul vs resident Kronecker K^T ---
        up = jnp.dot(m, kt, preferred_element_type=jnp.float32)   # (nb, hw)
        # --- x-side channel mix at high resolution (unrolled FMAs) ---
        hx = x[:, 0:hw] * wx_ref[co, 0]
        for ci in range(1, c):
            hx = hx + x[:, ci * hw:(ci + 1) * hw] * wx_ref[co, ci]
        # Direct per-channel store: aligned lane slice -> dense, unmasked vst.
        o_ref[:, co * hw:(co + 1) * hw] = (up + hx + bias_ref[co]).astype(o_ref.dtype)


def _choose_frames_per_block(n_frames: int, frame_bytes: int, budget_bytes: int) -> int:
    """Frames per grid step: multi-MiB blocks, second-minor block dim a multiple
    of 8 (or the full extent), and >= 2 grid steps when possible (v7x: 2 TCs)."""
    if n_frames <= 8:
        return n_frames                      # block extent == full dim -> always legal
    nb_cap = max(8, min(n_frames, budget_bytes // max(frame_bytes, 1)))
    steps = max(2, -(-n_frames // nb_cap))   # at least 2 grid steps
    nb = -(-n_frames // steps)               # balanced blocks -> minimal tail padding
    nb = -(-nb // 8) * 8                     # sublane-aligned second-minor dim
    return min(nb, -(-n_frames // 8) * 8)


def ssr_forward(x, x_cond, t, params, task_embed=None, *, block_budget_bytes=6 << 20):
    """x: (b, f*c, h, w); x_cond: (b, f*c, Hc, Wc) -> (b, f*c, h, w)."""
    # TODO(synk): UNetModel internals are external and config-dependent; they are
    # replaced by a deterministic pointwise (1x1x1) Conv3d 2c->c stand-in, so
    # `t` / `task_embed` are accepted but unused here.
    c = BASE_CHANNEL
    b, fc_total, h, w = x.shape
    f = fc_total // c
    hc_sz, wc_sz = x_cond.shape[-2:]
    n = b * f                                # number of frames
    hw, hwc = h * w, hc_sz * wc_sz

    # Free (metadata-only) HBM views, lane-dense last axis:
    #   'b (f c) h w'  ->  (b*f, c*h*w)
    x_r = x.reshape(n, c * hw)
    xc_r = x_cond.reshape(n, c * hwc)

    kt = _kron_interp_t(h, w, hc_sz, wc_sz)  # (hwc, hw), kept resident in VMEM
    # TODO(synk): for large spatial sizes where kron(Wh, Ww) no longer fits VMEM,
    # fall back to the separable (row-interp @ X @ col-interp^T) two-matmul form.

    wmat = params["w"]                       # (c, 2c): [:, :c] -> cond, [:, c:] -> x
    w_cond = wmat[:, :c]
    w_x = wmat[:, c:]
    bias = params["b"]

    frame_bytes = (2 * c * hw + c * hwc) * 4          # x row + out row + cond row (f32)
    nb = _choose_frames_per_block(n, frame_bytes, block_budget_bytes)
    grid = -(-n // nb)
    n_pad = grid * nb
    if n_pad != n:                                    # padded tail (awkward/prime n)
        x_r = jnp.pad(x_r, ((0, n_pad - n), (0, 0)))
        xc_r = jnp.pad(xc_r, ((0, n_pad - n), (0, 0)))

    vmem_need = 2 * nb * frame_bytes + 2 * int(kt.size) * 4 + (4 << 20)
    vmem_limit = int(min(48 << 20, max(32 << 20, vmem_need)))  # v7x-safe ceiling

    cost = pl.CostEstimate(
        flops=2 * n * c * hwc * hw + 2 * n * c * c * (hw + hwc),
        transcendentals=0,
        bytes_accessed=(2 * n * c * hw + n * c * hwc + int(kt.size)) * 4,
    )

    out = pl.pallas_call(
        functools.partial(_ssr_fused_kernel, c=c, hw=hw, hwc=hwc),
        out_shape=jax.ShapeDtypeStruct((n_pad, c * hw), jnp.float32),
        grid_spec=pltpu.PrefetchScalarGridSpec(
            num_scalar_prefetch=0,
            grid=(grid,),
            in_specs=[
                pl.BlockSpec(memory_space=pltpu.MemorySpace.SMEM),   # w_cond (c,c)
                pl.BlockSpec(memory_space=pltpu.MemorySpace.SMEM),   # w_x    (c,c)
                pl.BlockSpec(memory_space=pltpu.MemorySpace.SMEM),   # bias   (c,)
                pl.BlockSpec((hwc, hw), lambda i: (0, 0)),           # K^T (resident)
                pl.BlockSpec((nb, c * hw), lambda i: (i, 0)),        # x block
                pl.BlockSpec((nb, c * hwc), lambda i: (i, 0)),       # x_cond block
            ],
            out_specs=pl.BlockSpec((nb, c * hw), lambda i: (i, 0)),
        ),
        compiler_params=pltpu.CompilerParams(
            dimension_semantics=("parallel",),
            vmem_limit_bytes=vmem_limit,
        ),
        cost_estimate=cost,
    )(w_cond, w_x, bias, kt, x_r, xc_r)

    if n_pad != n:
        out = out[:n]
    # Free view back:  (b*f, c*h*w)  ->  'b (f c) h w'
    return out.reshape(b, f * c, h, w)


def _reference_forward(x, x_cond, params):
    """Pure-JAX reference of the same (placeholder-UNet) forward."""
    c = BASE_CHANNEL
    b, fc_total, h, w = x.shape
    f = fc_total // c
    hc_sz, wc_sz = x_cond.shape[-2:]
    wh = jnp.asarray(_bilinear_matrix_np(h, hc_sz))
    ww = jnp.asarray(_bilinear_matrix_np(w, wc_sz))
    xc = x_cond.reshape(b * f, c, hc_sz, wc_sz)
    hp = jax.lax.Precision.HIGHEST
    up = jnp.einsum('oh,nchw,vw->ncov', wh, xc, ww, precision=hp)  # (b*f, c, h, w)
    x5 = x.reshape(b * f, c, h, w)
    wmat = params["w"]
    out = (jnp.einsum('oc,nchw->nohw', wmat[:, :c], up, precision=hp)
           + jnp.einsum('oc,nchw->nohw', wmat[:, c:], x5, precision=hp)
           + params["b"][None, :, None, None])
    return out.reshape(b, f * c, h, w)


if __name__ == "__main__":
    key = jax.random.PRNGKey(0)
    k1, k2, k3, k4 = jax.random.split(key, 4)

    b, c, f = 2, BASE_CHANNEL, 2
    h = w = 16         # target spatial size
    hc = wc = 8        # low-res conditioning spatial size

    x = jax.random.normal(k1, (b, f * c, h, w), jnp.float32)
    x_cond = jax.random.normal(k2, (b, f * c, hc, wc), jnp.float32)
    t = jnp.zeros((b,), jnp.int32)

    params = {
        "w": 0.1 * jax.random.normal(k3, (c, 2 * c), jnp.float32),   # Cout=c, Cin=2c
        "b": 0.01 * jax.random.normal(k4, (c,), jnp.float32),
    }

    out = ssr_forward(x, x_cond, t, params)
    jax.block_until_ready(out)
    assert out.shape == (b, f * c, h, w), out.shape

    ref = _reference_forward(x, x_cond, params)
    max_err = float(jnp.max(jnp.abs(out - ref)))
    # Tolerance bounds worst-case default-precision MXU rounding of the f32
    # interp matmul; typical error is far smaller.  (Was 3e-2 before.)
    assert jnp.allclose(out, ref, atol=1e-2, rtol=1e-2), max_err

    print("KERNEL_OK")
</pallas_src>

<mosaic_0001>
module attributes {stable_mosaic.version = 11 : i64} {
  func.func @_ssr_fused_kernel(%arg0: i32, %arg1: memref<4x4xf32, #tpu.memory_space<smem>>, %arg2: memref<4x4xf32, #tpu.memory_space<smem>>, %arg3: memref<4xf32, #tpu.memory_space<smem>>, %arg4: memref<64x256xf32, #tpu.memory_space<vmem>>, %arg5: memref<4x1024xf32, #tpu.memory_space<vmem>>, %arg6: memref<4x256xf32, #tpu.memory_space<vmem>>, %arg7: memref<4x1024xf32, #tpu.memory_space<vmem>>) attributes {dimension_semantics = [#tpu.dimension_semantics<parallel>], iteration_bounds = array<i64: 1>, scalar_prefetch = 0 : i64, scratch_operands = 0 : i64, tpu.core_type = #tpu.core_type<tc>, window_params = [{transform_indices = @transform_0, window_bounds = array<i64: 4, 4>}, {transform_indices = @transform_1, window_bounds = array<i64: 4, 4>}, {transform_indices = @transform_2, window_bounds = array<i64: 4>}, {pipeline_mode = #tpu.pipeline_mode<synchronous>, transform_indices = @transform_3, window_bounds = array<i64: 64, 256>}, {transform_indices = @transform_4, window_bounds = array<i64: 4, 1024>}, {transform_indices = @transform_5, window_bounds = array<i64: 4, 256>}, {transform_indices = @transform_6, window_bounds = array<i64: 4, 1024>}]} {
    %c0 = arith.constant 0 : index
    %c0_0 = arith.constant 0 : index
    %0 = vector.load %arg5[%c0, %c0_0] : memref<4x1024xf32, #tpu.memory_space<vmem>>, vector<4x1024xf32>
    %c0_1 = arith.constant 0 : index
    %c0_2 = arith.constant 0 : index
    %1 = vector.load %arg6[%c0_1, %c0_2] : memref<4x256xf32, #tpu.memory_space<vmem>>, vector<4x256xf32>
    %c0_3 = arith.constant 0 : index
    %c0_4 = arith.constant 0 : index
    %2 = vector.load %arg4[%c0_3, %c0_4] : memref<64x256xf32, #tpu.memory_space<vmem>>, vector<64x256xf32>
    %3 = vector.extract_strided_slice %1 {offsets = [0, 0], sizes = [4, 64], strides = [1, 1]} : vector<4x256xf32> to vector<4x64xf32>
    %c0_5 = arith.constant 0 : index
    %c0_6 = arith.constant 0 : index
    %4 = memref.load %arg1[%c0_5, %c0_6] : memref<4x4xf32, #tpu.memory_space<smem>>
    %5 = vector.broadcast %4 : f32 to vector<4x64xf32>
    %6 = arith.mulf %3, %5 : vector<4x64xf32>
    %7 = vector.extract_strided_slice %1 {offsets = [0, 64], sizes = [4, 64], strides = [1, 1]} : vector<4x256xf32> to vector<4x64xf32>
    %c0_7 = arith.constant 0 : index
    %c1 = arith.constant 1 : index
    %8 = memref.load %arg1[%c0_7, %c1] : memref<4x4xf32, #tpu.memory_space<smem>>
    %9 = vector.broadcast %8 : f32 to vector<4x64xf32>
    %10 = arith.mulf %7, %9 : vector<4x64xf32>
    %11 = arith.addf %6, %10 : vector<4x64xf32>
    %12 = vector.extract_strided_slice %1 {offsets = [0, 128], sizes = [4, 64], strides = [1, 1]} : vector<4x256xf32> to vector<4x64xf32>
    %c0_8 = arith.constant 0 : index
    %c2 = arith.constant 2 : index
    %13 = memref.load %arg1[%c0_8, %c2] : memref<4x4xf32, #tpu.memory_space<smem>>
    %14 = vector.broadcast %13 : f32 to vector<4x64xf32>
    %15 = arith.mulf %12, %14 : vector<4x64xf32>
    %16 = arith.addf %11, %15 : vector<4x64xf32>
    %17 = vector.extract_strided_slice %1 {offsets = [0, 192], sizes = [4, 64], strides = [1, 1]} : vector<4x256xf32> to vector<4x64xf32>
    %c0_9 = arith.constant 0 : index
    %c3 = arith.constant 3 : index
    %18 = memref.load %arg1[%c0_9, %c3] : memref<4x4xf32, #tpu.memory_space<smem>>
    %19 = vector.broadcast %18 : f32 to vector<4x64xf32>
    %20 = arith.mulf %17, %19 : vector<4x64xf32>
    %21 = arith.addf %16, %20 : vector<4x64xf32>
    %cst = arith.constant dense<0.000000e+00> : vector<4x256xf32>
    %22 = tpu.matmul %21, %2, %cst {dimension_numbers = #tpu.dot_dimension_numbers<[1], [0], [0], [1], [0, 0, 1, 1], [], []>} : vector<4x64xf32>, vector<64x256xf32>, vector<4x256xf32> -> vector<4x256xf32>
    %23 = vector.extract_strided_slice %0 {offsets = [0, 0], sizes = [4, 256], strides = [1, 1]} : vector<4x1024xf32> to vector<4x256xf32>
    %c0_10 = arith.constant 0 : index
    %c0_11 = arith.constant 0 : index
    %24 = memref.load %arg2[%c0_10, %c0_11] : memref<4x4xf32, #tpu.memory_space<smem>>
    %25 = vector.broadcast %24 : f32 to vector<4x256xf32>
    %26 = arith.mulf %23, %25 : vector<4x256xf32>
    %27 = vector.extract_strided_slice %0 {offsets = [0, 256], sizes = [4, 256], strides = [1, 1]} : vector<4x1024xf32> to vector<4x256xf32>
    %c0_12 = arith.constant 0 : index
    %c1_13 = arith.constant 1 : index
    %28 = memref.load %arg2[%c0_12, %c1_13] : memref<4x4xf32, #tpu.memory_space<smem>>
    %29 = vector.broadcast %28 : f32 to vector<4x256xf32>
    %30 = arith.mulf %27, %29 : vector<4x256xf32>
    %31 = arith.addf %26, %30 : vector<4x256xf32>
    %32 = vector.extract_strided_slice %0 {offsets = [0, 512], sizes = [4, 256], strides = [1, 1]} : vector<4x1024xf32> to vector<4x256xf32>
    %c0_14 = arith.constant 0 : index
    %c2_15 = arith.constant 2 : index
    %33 = memref.load %arg2[%c0_14, %c2_15] : memref<4x4xf32, #tpu.memory_space<smem>>
    %34 = vector.broadcast %33 : f32 to vector<4x256xf32>
    %35 = arith.mulf %32, %34 : vector<4x256xf32>
    %36 = arith.addf %31, %35 : vector<4x256xf32>
    %37 = vector.extract_strided_slice %0 {offsets = [0, 768], sizes = [4, 256], strides = [1, 1]} : vector<4x1024xf32> to vector<4x256xf32>
    %c0_16 = arith.constant 0 : index
    %c3_17 = arith.constant 3 : index
    %38 = memref.load %arg2[%c0_16, %c3_17] : memref<4x4xf32, #tpu.memory_space<smem>>
    %39 = vector.broadcast %38 : f32 to vector<4x256xf32>
    %40 = arith.mulf %37, %39 : vector<4x256xf32>
    %41 = arith.addf %36, %40 : vector<4x256xf32>
    %42 = arith.addf %22, %41 : vector<4x256xf32>
    %c0_18 = arith.constant 0 : index
    %43 = memref.load %arg3[%c0_18] : memref<4xf32, #tpu.memory_space<smem>>
    %44 = vector.broadcast %43 : f32 to vector<4x256xf32>
    %45 = arith.addf %42, %44 : vector<4x256xf32>
    %c0_19 = arith.constant 0 : index
    %c0_20 = arith.constant 0 : index
    %46 = vector.load %arg7[%c0_19, %c0_20] : memref<4x1024xf32, #tpu.memory_space<vmem>>, vector<4x256xf32>
    tpu.vector_store %arg7[%c0_19, %c0_20], %45 {strides = array<i32>} : memref<4x1024xf32, #tpu.memory_space<vmem>>, vector<4x256xf32>,
    %47 = vector.extract_strided_slice %1 {offsets = [0, 0], sizes = [4, 64], strides = [1, 1]} : vector<4x256xf32> to vector<4x64xf32>
    %c1_21 = arith.constant 1 : index
    %c0_22 = arith.constant 0 : index
    %48 = memref.load %arg1[%c1_21, %c0_22] : memref<4x4xf32, #tpu.memory_space<smem>>
    %49 = vector.broadcast %48 : f32 to vector<4x64xf32>
    %50 = arith.mulf %47, %49 : vector<4x64xf32>
    %51 = vector.extract_strided_slice %1 {offsets = [0, 64], sizes = [4, 64], strides = [1, 1]} : vector<4x256xf32> to vector<4x64xf32>
    %c1_23 = arith.constant 1 : index
    %c1_24 = arith.constant 1 : index
    %52 = memref.load %arg1[%c1_23, %c1_24] : memref<4x4xf32, #tpu.memory_space<smem>>
    %53 = vector.broadcast %52 : f32 to vector<4x64xf32>
    %54 = arith.mulf %51, %53 : vector<4x64xf32>
    %55 = arith.addf %50, %54 : vector<4x64xf32>
    %56 = vector.extract_strided_slice %1 {offsets = [0, 128], sizes = [4, 64], strides = [1, 1]} : vector<4x256xf32> to vector<4x64xf32>
    %c1_25 = arith.constant 1 : index
    %c2_26 = arith.constant 2 : index
    %57 = memref.load %arg1[%c1_25, %c2_26] : memref<4x4xf32, #tpu.memory_space<smem>>
    %58 = vector.broadcast %57 : f32 to vector<4x64xf32>
    %59 = arith.mulf %56, %58 : vector<4x64xf32>
    %60 = arith.addf %55, %59 : vector<4x64xf32>
    %61 = vector.extract_strided_slice %1 {offsets = [0, 192], sizes = [4, 64], strides = [1, 1]} : vector<4x256xf32> to vector<4x64xf32>
    %c1_27 = arith.constant 1 : index
    %c3_28 = arith.constant 3 : index
    %62 = memref.load %arg1[%c1_27, %c3_28] : memref<4x4xf32, #tpu.memory_space<smem>>
    %63 = vector.broadcast %62 : f32 to vector<4x64xf32>
    %64 = arith.mulf %61, %63 : vector<4x64xf32>
    %65 = arith.addf %60, %64 : vector<4x64xf32>
    %cst_29 = arith.constant dense<0.000000e+00> : vector<4x256xf32>
    %66 = tpu.matmul %65, %2, %cst_29 {dimension_numbers = #tpu.dot_dimension_numbers<[1], [0], [0], [1], [0, 0, 1, 1], [], []>} : vector<4x64xf32>, vector<64x256xf32>, vector<4x256xf32> -> vector<4x256xf32>
    %67 = vector.extract_strided_slice %0 {offsets = [0, 0], sizes = [4, 256], strides = [1, 1]} : vector<4x1024xf32> to vector<4x256xf32>
    %c1_30 = arith.constant 1 : index
    %c0_31 = arith.constant 0 : index
    %68 = memref.load %arg2[%c1_30, %c0_31] : memref<4x4xf32, #tpu.memory_space<smem>>
    %69 = vector.broadcast %68 : f32 to vector<4x256xf32>
    %70 = arith.mulf %67, %69 : vector<4x256xf32>
    %71 = vector.extract_strided_slice %0 {offsets = [0, 256], sizes = [4, 256], strides = [1, 1]} : vector<4x1024xf32> to vector<4x256xf32>
    %c1_32 = arith.constant 1 : index
    %c1_33 = arith.constant 1 : index
    %72 = memref.load %arg2[%c1_32, %c1_33] : memref<4x4xf32, #tpu.memory_space<smem>>
    %73 = vector.broadcast %72 : f32 to vector<4x256xf32>
    %74 = arith.mulf %71, %73 : vector<4x256xf32>
    %75 = arith.addf %70, %74 : vector<4x256xf32>
    %76 = vector.extract_strided_slice %0 {offsets = [0, 512], sizes = [4, 256], strides = [1, 1]} : vector<4x1024xf32> to vector<4x256xf32>
    %c1_34 = arith.constant 1 : index
    %c2_35 = arith.constant 2 : index
    %77 = memref.load %arg2[%c1_34, %c2_35] : memref<4x4xf32, #tpu.memory_space<smem>>
    %78 = vector.broadcast %77 : f32 to vector<4x256xf32>
    %79 = arith.mulf %76, %78 : vector<4x256xf32>
    %80 = arith.addf %75, %79 : vector<4x256xf32>
    %81 = vector.extract_strided_slice %0 {offsets = [0, 768], sizes = [4, 256], strides = [1, 1]} : vector<4x1024xf32> to vector<4x256xf32>
    %c1_36 = arith.constant 1 : index
    %c3_37 = arith.constant 3 : index
    %82 = memref.load %arg2[%c1_36, %c3_37] : memref<4x4xf32, #tpu.memory_space<smem>>
    %83 = vector.broadcast %82 : f32 to vector<4x256xf32>
    %84 = arith.mulf %81, %83 : vector<4x256xf32>
    %85 = arith.addf %80, %84 : vector<4x256xf32>
    %86 = arith.addf %66, %85 : vector<4x256xf32>
    %c1_38 = arith.constant 1 : index
    %87 = memref.load %arg3[%c1_38] : memref<4xf32, #tpu.memory_space<smem>>
    %88 = vector.broadcast %87 : f32 to vector<4x256xf32>
    %89 = arith.addf %86, %88 : vector<4x256xf32>
    %c0_39 = arith.constant 0 : index
    %c256 = arith.constant 256 : index
    %90 = vector.load %arg7[%c0_39, %c256] : memref<4x1024xf32, #tpu.memory_space<vmem>>, vector<4x256xf32>
    tpu.vector_store %arg7[%c0_39, %c256], %89 {strides = array<i32>} : memref<4x1024xf32, #tpu.memory_space<vmem>>, vector<4x256xf32>,
    %91 = vector.extract_strided_slice %1 {offsets = [0, 0], sizes = [4, 64], strides = [1, 1]} : vector<4x256xf32> to vector<4x64xf32>
    %c2_40 = arith.constant 2 : index
    %c0_41 = arith.constant 0 : index
    %92 = memref.load %arg1[%c2_40, %c0_41] : memref<4x4xf32, #tpu.memory_space<smem>>
    %93 = vector.broadcast %92 : f32 to vector<4x64xf32>
    %94 = arith.mulf %91, %93 : vector<4x64xf32>
    %95 = vector.extract_strided_slice %1 {offsets = [0, 64], sizes = [4, 64], strides = [1, 1]} : vector<4x256xf32> to vector<4x64xf32>
    %c2_42 = arith.constant 2 : index
    %c1_43 = arith.constant 1 : index
    %96 = memref.load %arg1[%c2_42, %c1_43] : memref<4x4xf32, #tpu.memory_space<smem>>
    %97 = vector.broadcast %96 : f32 to vector<4x64xf32>
    %98 = arith.mulf %95, %97 : vector<4x64xf32>
    %99 = arith.addf %94, %98 : vector<4x64xf32>
    %100 = vector.extract_strided_slice %1 {offsets = [0, 128], sizes = [4, 64], strides = [1, 1]} : vector<4x256xf32> to vector<4x64xf32>
    %c2_44 = arith.constant 2 : index
    %c2_45 = arith.constant 2 : index
    %101 = memref.load %arg1[%c2_44, %c2_45] : memref<4x4xf32, #tpu.memory_space<smem>>
    %102 = vector.broadcast %101 : f32 to vector<4x64xf32>
    %103 = arith.mulf %100, %102 : vector<4x64xf32>
    %104 = arith.addf %99, %103 : vector<4x64xf32>
    %105 = vector.extract_strided_slice %1 {offsets = [0, 192], sizes = [4, 64], strides = [1, 1]} : vector<4x256xf32> to vector<4x64xf32>
    %c2_46 = arith.constant 2 : index
    %c3_47 = arith.constant 3 : index
    %106 = memref.load %arg1[%c2_46, %c3_47] : memref<4x4xf32, #tpu.memory_space<smem>>
    %107 = vector.broadcast %106 : f32 to vector<4x64xf32>
    %108 = arith.mulf %105, %107 : vector<4x64xf32>
    %109 = arith.addf %104, %108 : vector<4x64xf32>
    %cst_48 = arith.constant dense<0.000000e+00> : vector<4x256xf32>
    %110 = tpu.matmul %109, %2, %cst_48 {dimension_numbers = #tpu.dot_dimension_numbers<[1], [0], [0], [1], [0, 0, 1, 1], [], []>} : vector<4x64xf32>, vector<64x256xf32>, vector<4x256xf32> -> vector<4x256xf32>
    %111 = vector.extract_strided_slice %0 {offsets = [0, 0], sizes = [4, 256], strides = [1, 1]} : vector<4x1024xf32> to vector<4x256xf32>
    %c2_49 = arith.constant 2 : index
    %c0_50 = arith.constant 0 : index
    %112 = memref.load %arg2[%c2_49, %c0_50] : memref<4x4xf32, #tpu.memory_space<smem>>
    %113 = vector.broadcast %112 : f32 to vector<4x256xf32>
    %114 = arith.mulf %111, %113 : vector<4x256xf32>
    %115 = vector.extract_strided_slice %0 {offsets = [0, 256], sizes = [4, 256], strides = [1, 1]} : vector<4x1024xf32> to vector<4x256xf32>
    %c2_51 = arith.constant 2 : index
    %c1_52 = arith.constant 1 : index
    %116 = memref.load %arg2[%c2_51, %c1_52] : memref<4x4xf32, #tpu.memory_space<smem>>
    %117 = vector.broadcast %116 : f32 to vector<4x256xf32>
    %118 = arith.mulf %115, %117 : vector<4x256xf32>
    %119 = arith.addf %114, %118 : vector<4x256xf32>
    %120 = vector.extract_strided_slice %0 {offsets = [0, 512], sizes = [4, 256], strides = [1, 1]} : vector<4x1024xf32> to vector<4x256xf32>
    %c2_53 = arith.constant 2 : index
    %c2_54 = arith.constant 2 : index
    %121 = memref.load %arg2[%c2_53, %c2_54] : memref<4x4xf32, #tpu.memory_space<smem>>
    %122 = vector.broadcast %121 : f32 to vector<4x256xf32>
    %123 = arith.mulf %120, %122 : vector<4x256xf32>
    %124 = arith.addf %119, %123 : vector<4x256xf32>
    %125 = vector.extract_strided_slice %0 {offsets = [0, 768], sizes = [4, 256], strides = [1, 1]} : vector<4x1024xf32> to vector<4x256xf32>
    %c2_55 = arith.constant 2 : index
    %c3_56 = arith.constant 3 : index
    %126 = memref.load %arg2[%c2_55, %c3_56] : memref<4x4xf32, #tpu.memory_space<smem>>
    %127 = vector.broadcast %126 : f32 to vector<4x256xf32>
    %128 = arith.mulf %125, %127 : vector<4x256xf32>
    %129 = arith.addf %124, %128 : vector<4x256xf32>
    %130 = arith.addf %110, %129 : vector<4x256xf32>
    %c2_57 = arith.constant 2 : index
    %131 = memref.load %arg3[%c2_57] : memref<4xf32, #tpu.memory_space<smem>>
    %132 = vector.broadcast %131 : f32 to vector<4x256xf32>
    %133 = arith.addf %130, %132 : vector<4x256xf32>
    %c0_58 = arith.constant 0 : index
    %c512 = arith.constant 512 : index
    %134 = vector.load %arg7[%c0_58, %c512] : memref<4x1024xf32, #tpu.memory_space<vmem>>, vector<4x256xf32>
    tpu.vector_store %arg7[%c0_58, %c512], %133 {strides = array<i32>} : memref<4x1024xf32, #tpu.memory_space<vmem>>, vector<4x256xf32>,
    %135 = vector.extract_strided_slice %1 {offsets = [0, 0], sizes = [4, 64], strides = [1, 1]} : vector<4x256xf32> to vector<4x64xf32>
    %c3_59 = arith.constant 3 : index
    %c0_60 = arith.constant 0 : index
    %136 = memref.load %arg1[%c3_59, %c0_60] : memref<4x4xf32, #tpu.memory_space<smem>>
    %137 = vector.broadcast %136 : f32 to vector<4x64xf32>
    %138 = arith.mulf %135, %137 : vector<4x64xf32>
    %139 = vector.extract_strided_slice %1 {offsets = [0, 64], sizes = [4, 64], strides = [1, 1]} : vector<4x256xf32> to vector<4x64xf32>
    %c3_61 = arith.constant 3 : index
    %c1_62 = arith.constant 1 : index
    %140 = memref.load %arg1[%c3_61, %c1_62] : memref<4x4xf32, #tpu.memory_space<smem>>
    %141 = vector.broadcast %140 : f32 to vector<4x64xf32>
    %142 = arith.mulf %139, %141 : vector<4x64xf32>
    %143 = arith.addf %138, %142 : vector<4x64xf32>
    %144 = vector.extract_strided_slice %1 {offsets = [0, 128], sizes = [4, 64], strides = [1, 1]} : vector<4x256xf32> to vector<4x64xf32>
    %c3_63 = arith.constant 3 : index
    %c2_64 = arith.constant 2 : index
    %145 = memref.load %arg1[%c3_63, %c2_64] : memref<4x4xf32, #tpu.memory_space<smem>>
    %146 = vector.broadcast %145 : f32 to vector<4x64xf32>
    %147 = arith.mulf %144, %146 : vector<4x64xf32>
    %148 = arith.addf %143, %147 : vector<4x64xf32>
    %149 = vector.extract_strided_slice %1 {offsets = [0, 192], sizes = [4, 64], strides = [1, 1]} : vector<4x256xf32> to vector<4x64xf32>
    %c3_65 = arith.constant 3 : index
    %c3_66 = arith.constant 3 : index
    %150 = memref.load %arg1[%c3_65, %c3_66] : memref<4x4xf32, #tpu.memory_space<smem>>
    %151 = vector.broadcast %150 : f32 to vector<4x64xf32>
    %152 = arith.mulf %149, %151 : vector<4x64xf32>
    %153 = arith.addf %148, %152 : vector<4x64xf32>
    %cst_67 = arith.constant dense<0.000000e+00> : vector<4x256xf32>
    %154 = tpu.matmul %153, %2, %cst_67 {dimension_numbers = #tpu.dot_dimension_numbers<[1], [0], [0], [1], [0, 0, 1, 1], [], []>} : vector<4x64xf32>, vector<64x256xf32>, vector<4x256xf32> -> vector<4x256xf32>
    %155 = vector.extract_strided_slice %0 {offsets = [0, 0], sizes = [4, 256], strides = [1, 1]} : vector<4x1024xf32> to vector<4x256xf32>
    %c3_68 = arith.constant 3 : index
    %c0_69 = arith.constant 0 : index
    %156 = memref.load %arg2[%c3_68, %c0_69] : memref<4x4xf32, #tpu.memory_space<smem>>
    %157 = vector.broadcast %156 : f32 to vector<4x256xf32>
    %158 = arith.mulf %155, %157 : vector<4x256xf32>
    %159 = vector.extract_strided_slice %0 {offsets = [0, 256], sizes = [4, 256], strides = [1, 1]} : vector<4x1024xf32> to vector<4x256xf32>
    %c3_70 = arith.constant 3 : index
    %c1_71 = arith.constant 1 : index
    %160 = memref.load %arg2[%c3_70, %c1_71] : memref<4x4xf32, #tpu.memory_space<smem>>
    %161 = vector.broadcast %160 : f32 to vector<4x256xf32>
    %162 = arith.mulf %159, %161 : vector<4x256xf32>
    %163 = arith.addf %158, %162 : vector<4x256xf32>
    %164 = vector.extract_strided_slice %0 {offsets = [0, 512], sizes = [4, 256], strides = [1, 1]} : vector<4x1024xf32> to vector<4x256xf32>
    %c3_72 = arith.constant 3 : index
    %c2_73 = arith.constant 2 : index
    %165 = memref.load %arg2[%c3_72, %c2_73] : memref<4x4xf32, #tpu.memory_space<smem>>
    %166 = vector.broadcast %165 : f32 to vector<4x256xf32>
    %167 = arith.mulf %164, %166 : vector<4x256xf32>
    %168 = arith.addf %163, %167 : vector<4x256xf32>
    %169 = vector.extract_strided_slice %0 {offsets = [0, 768], sizes = [4, 256], strides = [1, 1]} : vector<4x1024xf32> to vector<4x256xf32>
    %c3_74 = arith.constant 3 : index
    %c3_75 = arith.constant 3 : index
    %170 = memref.load %arg2[%c3_74, %c3_75] : memref<4x4xf32, #tpu.memory_space<smem>>
    %171 = vector.broadcast %170 : f32 to vector<4x256xf32>
    %172 = arith.mulf %169, %171 : vector<4x256xf32>
    %173 = arith.addf %168, %172 : vector<4x256xf32>
    %174 = arith.addf %154, %173 : vector<4x256xf32>
    %c3_76 = arith.constant 3 : index
    %175 = memref.load %arg3[%c3_76] : memref<4xf32, #tpu.memory_space<smem>>
    %176 = vector.broadcast %175 : f32 to vector<4x256xf32>
    %177 = arith.addf %174, %176 : vector<4x256xf32>
    %c0_77 = arith.constant 0 : index
    %c768 = arith.constant 768 : index
    %178 = vector.load %arg7[%c0_77, %c768] : memref<4x1024xf32, #tpu.memory_space<vmem>>, vector<4x256xf32>
    tpu.vector_store %arg7[%c0_77, %c768], %177 {strides = array<i32>} : memref<4x1024xf32, #tpu.memory_space<vmem>>, vector<4x256xf32>,
    return
  }
  func.func @transform_0(%arg0: i32) -> (i32, i32) {
    %c0_i32 = arith.constant 0 : i32
    %c0_i32_0 = arith.constant 0 : i32
    %c0_i32_1 = arith.constant 0 : i32
    return %c0_i32, %c0_i32_0 : i32, i32
  }
  func.func @transform_1(%arg0: i32) -> (i32, i32) {
    %c0_i32 = arith.constant 0 : i32
    %c0_i32_0 = arith.constant 0 : i32
    %c0_i32_1 = arith.constant 0 : i32
    return %c0_i32, %c0_i32_0 : i32, i32
  }
  func.func @transform_2(%arg0: i32) -> i32 {
    %c0_i32 = arith.constant 0 : i32
    %c0_i32_0 = arith.constant 0 : i32
    return %c0_i32 : i32
  }
  func.func @transform_3(%arg0: i32) -> (i32, i32) {
    %c0_i32 = arith.constant 0 : i32
    %c0_i32_0 = arith.constant 0 : i32
    %c0_i32_1 = arith.constant 0 : i32
    return %c0_i32, %c0_i32_0 : i32, i32
  }
  func.func @transform_4(%arg0: i32) -> (i32, i32) {
    %c0_i32 = arith.constant 0 : i32
    %c0_i32_0 = arith.constant 0 : i32
    return %arg0, %c0_i32 : i32, i32
  }
  func.func @transform_5(%arg0: i32) -> (i32, i32) {
    %c0_i32 = arith.constant 0 : i32
    %c0_i32_0 = arith.constant 0 : i32
    return %arg0, %c0_i32 : i32, i32
  }
  func.func @transform_6(%arg0: i32) -> (i32, i32) {
    %c0_i32 = arith.constant 0 : i32
    %c0_i32_0 = arith.constant 0 : i32
    return %arg0, %c0_i32 : i32, i32
  }
}

</mosaic_0001>

<bundles_post_ra>
// kernel: tpu_custom_call.1
= control target key start
LH: loop header
LB: loop body
LE: loop exit
PB: predicated region body
PF: predicated region fallthrough
CT: control target
= control target key end

     0   :  { %11 = vsyncpa [#allocation5], 0  ;;  %s1029_s0 = inlined_call_operand.hbm [shape: f32[4,4], index: 0, kind: input, shape index: {}]   ;;  %s1030_s1 = inlined_call_operand.hbm [shape: f32[4,4], index: 1, kind: input, shape index: {}]   ;;  %s1031_s2 = inlined_call_operand.vmem [shape: f32[4], index: 2, kind: input, shape index: {}]   ;;  %s1032_s3 = inlined_call_operand.hbm [shape: f32[64,256], index: 3, kind: input, shape index: {}]   ;;  %s1033_s4 = inlined_call_operand.hbm [shape: f32[4,1024], index: 4, kind: input, shape index: {}]   ;;  %s1034_s5 = inlined_call_operand.vmem [shape: f32[4,256], index: 5, kind: input, shape index: {}]   ;;  %s1035_s6 = inlined_call_operand.hbm [shape: f32[4,1024], index: 6, kind: output, shape index: {}]  }
   0x1   :  { %12 = vsyncpa [#allocation8], 0 }
   0x2   :  { %13 = vsyncpa [#allocation6], 0 }
   0x3   :  { %14 = vsyncpa [#allocation3], 0 }
   0x4   :  { %15 = vsyncpa [#allocation12], 0 }
   0x5   :  { %16 = vsyncpa [#allocation4], 0  ;;  %s722_s23 = scalar_lea.hbm %s1029_s0, 64 }
   0x6   :  { %p723_p0 = scmp.ne.s32.totalorder %s1029_s0, %s722_s23  ;;  %p726_p1 = scmp.lt.u32.totalorder %s722_s23, %s1029_s0 }
   0x8   :  { %p728_p2 = pnand %p726_p1, %p723_p0 }
   0xa   :  { %731 = shalt.err (!%p728_p2)
}
   0xb   :  { %s832_s28 = smov [#allocation2]   ;;  %s732_s9 = scalar_lea.hbm %s1030_s1, 64 }
   0xc   :  { %24 = dma.hbm_to_smem %s1029_s0, 64, %s832_s28, [#allocation5]  }
   0xd   :  { %p733_p3 = scmp.ne.s32.totalorder %s1030_s1, %s732_s9  ;;  %p736_p4 = scmp.lt.u32.totalorder %s732_s9, %s1030_s1 }
   0xf   :  { %p738_p5 = pnand %p736_p4, %p733_p3 }
  0x11   :  { %741 = shalt.err (!%p738_p5)
}
  0x12   :  { %s833_s14 = smov [#allocation7]   ;;  %s39_s18 = sshll.u32 %s1031_s2, 4  ;;  %s40_s18 = int_to_ptr.vmem [resolvable:$true] %s39_s18 }
  0x13   :  { %32 = dma.hbm_to_smem %s1030_s1, 64, %s833_s14, [#allocation8]  }
  0x14   :  { %s742_s19 = scalar_lea.vmem %s40_s18, 16  ;;  %p747_p7 = scmp.lt.s32.totalorder %s40_s18, %s40_s18 }
  0x15   :  { %p743_p6 = scmp.ne.s32.totalorder %s40_s18, %s742_s19  ;;  %p748_p8 = scmp.lt.s32.totalorder %s742_s19, %s742_s19 }
  0x17   :  { %p749_p9 = por %p748_p8, %p747_p7 }
  0x19   :  { %p750_p10 = pnand %p749_p9, %p743_p6 }
  0x1b   :  { %753 = shalt.err (!%p750_p10)
}
  0x1c   :  { %s834_s20 = smov [#allocation9]   ;;  %s835_s21 = smov [#allocation10]  }
  0x1d   :  { %42 = dma.vmem_to_smem %s40_s18, 16, %s834_s20, [#allocation6]  }
  0x1e   :  { %s48_s22 = sshll.u32 %s835_s21, 4  ;;  %s754_s1 = scalar_lea.hbm %s1032_s3, 2048  ;;  %s49_s22 = int_to_ptr.vmem [resolvable:$true] %s48_s22 }
  0x1f   :  { %p755_p11 = scmp.ne.s32.totalorder %s1032_s3, %s754_s1  ;;  %p758_p12 = scmp.lt.u32.totalorder %s754_s1, %s1032_s3 }
  0x21   :  { %p760_p13 = pnand %p758_p12, %p755_p11 }
  0x23   :  { %763 = shalt.err (!%p760_p13)
}
  0x24   :  { %s764_s28 = scalar_lea.vmem %s49_s22, 2048  ;;  %p769_p1 = scmp.lt.s32.totalorder %s49_s22, %s49_s22 }
  0x25   :  { %p765_p0 = scmp.ne.s32.totalorder %s49_s22, %s764_s28  ;;  %p770_p2 = scmp.lt.s32.totalorder %s764_s28, %s764_s28 }
  0x27   :  { %p771_p3 = por %p770_p2, %p769_p1 }
  0x29   :  { %p772_p4 = pnand %p771_p3, %p765_p0 }
  0x2b   :  { %775 = shalt.err (!%p772_p4)
}
  0x2c   :  { %s836_s29 = smov 256   ;;  %s837_s30 = smov 16  }
  0x2d   :  { %54 = dma.hbm_to_vmem [thread:$0]  %s1032_s3, 2048, %s49_s22, [#allocation3], %s836_s29, %s836_s29, %s837_s30  }
  0x2e   :  { %s838_s9 = smov [#allocation11]   ;;  %s776_s13 = scalar_lea.hbm %s1033_s4, 512 }
  0x2f   :  { %s61_s10 = sshll.u32 %s838_s9, 4  ;;  %p777_p5 = scmp.ne.s32.totalorder %s1033_s4, %s776_s13  ;;  %s62_s10 = int_to_ptr.vmem [resolvable:$true] %s61_s10 }
  0x30   :  { %p780_p6 = scmp.lt.u32.totalorder %s776_s13, %s1033_s4 }
  0x32   :  { %p782_p7 = pnand %p780_p6, %p777_p5 }
  0x34   :  { %785 = shalt.err (!%p782_p7)
}
  0x35   :  { %s786_s17 = scalar_lea.vmem %s62_s10, 512  ;;  %p791_p9 = scmp.lt.s32.totalorder %s62_s10, %s62_s10 }
  0x36   :  { %p787_p8 = scmp.ne.s32.totalorder %s62_s10, %s786_s17  ;;  %p792_p10 = scmp.lt.s32.totalorder %s786_s17, %s786_s17 }
  0x38   :  { %p793_p11 = por %p792_p10, %p791_p9 }
  0x3a   :  { %p794_p12 = pnand %p793_p11, %p787_p8 }
  0x3c   :  { %797 = shalt.err (!%p794_p12)
}
  0x3d   :  { %64 = dma.hbm_to_vmem [thread:$0]  %s1033_s4, 512, %s62_s10, [#allocation12]  }
  0x3e   :  { %820 = dma.done.wait [#allocation5], 64  }
  0x3f   :  { %821 = vsyncadd [#allocation5], 4294967232 }
  0x40   :  { %822 = dma.done.wait [#allocation8], 64  }
  0x41   :  { %823 = vsyncadd [#allocation8], 4294967232 }
  0x42   :  { %824 = dma.done.wait [#allocation6], 16  }
  0x43   :  { %825 = vsyncadd [#allocation6], 4294967280 }
  0x44   :  { %826 = dma.done.wait [#allocation3], 2048  }
  0x45   :  { %827 = vsyncadd [#allocation3], 4294965248 }
  0x46   :  { %828 = dma.done.wait [#allocation12], 512  }
  0x47   :  { %829 = vsyncadd [#allocation12], 4294966784 }
  0x48   :  { %82 = sfence }
  0x49   :  { %s928_s19 = sld [smem:[#allocation2 + $0x81]]  ;;  %v89_v0 = vld [vmem:[#allocation10 + $0x8] sm:$0xff]  ;;  %v91_v1 = vld [vmem:[#allocation10 + $0x18] sm:$0xff]  ;;  %v88_v3 = vld [vmem:[#allocation10] sm:$0xff]  ;;  %v840_v31 = vmov 0.0   ;;  %s618_s24 = sld [smem:[#allocation2 + $0x80]] }
  0x4a   :  { %s930_s20 = sld [smem:[#allocation2 + $0x1]]  ;;  %v648_v2 = vpack.c.bf16 %v91_v1, %v89_v0  ;;  %v90_v4 = vld [vmem:[#allocation10 + $0x10] sm:$0xff]  ;;  %v93_v6 = vld [vmem:[#allocation10 + $0x28] sm:$0xff]  ;;  %v95_v7 = vld [vmem:[#allocation10 + $0x38] sm:$0xff]  ;;  %216 = vmatprep.mubr.f32.mxu0 %v840_v31  ;;  %336 = vmatprep.mubr.f32.mxu1 %v840_v31  ;;  %s104_s1 = sld [smem:[#allocation2]]  ;;  %vm148_vm0 = vcmask 523264  }
  0x4b   :  { %s932_s21 = sld [smem:[#allocation2 + $0x101]]  ;;  %v934_v5 = vpack.c.bf16 %v90_v4, %v88_v3  ;;  %v92_v8 = vld [vmem:[#allocation10 + $0x20] sm:$0xff]  ;;  %v938_v9 = vpack.c.bf16 %v95_v7, %v93_v6  ;;  %v94_v10 = vld [vmem:[#allocation10 + $0x30] sm:$0xff]  ;;  %v97_v11 = vld [vmem:[#allocation10 + $0x48] sm:$0xff]  ;;  %s620_s25 = sld [smem:[#allocation2 + $0x82]] }
  0x4c   :  { %s936_s4 = sld [smem:[#allocation2 + $0x181]]  ;;  %649 = vmatprep.subr.bf16.mxu0 %v648_v2  ;;  %665 = vmatprep.subr.bf16.mxu1 %v648_v2  ;;  %v943_v12 = vld [vmem:[%s1034_s5] sm:$0xff]  ;;  %v947_v13 = vpack.c.bf16 %v94_v10, %v92_v8  ;;  %v96_v16 = vld [vmem:[#allocation10 + $0x40] sm:$0xff]  ;;  %v98_v17 = vld [vmem:[#allocation10 + $0x50] sm:$0xff]  ;;  %s839_s5 = smov 64  }
  0x4d   :  { %651 = vmatpush1.bf16.msra.mxu0 %v934_v5  ;;  %667 = vmatpush1.bf16.msra.mxu1 %v934_v5  ;;  %v99_v14 = vld [vmem:[#allocation10 + $0x58] sm:$0xff]  ;;  %v101_v19 = vld [vmem:[#allocation10 + $0x68] sm:$0xff]  ;;  %v960_v25 = vpack.c.bf16 %v98_v17, %v96_v16  ;;  %v100_v28 = vld [vmem:[#allocation10 + $0x60] sm:$0xff]  ;;  %s612_s26 = sld [smem:[#allocation2 + $0x2]]  ;;  %s613_s2 = sld [smem:[#allocation2 + $0x3]]  ;;  %v118_v38 = vrot.slane %v943_v12, 4 }
  0x4e   :  { %653 = vmatprep.subr.bf16.mxu0 %v938_v9  ;;  %669 = vmatprep.subr.bf16.mxu1 %v938_v9  ;;  %v951_v15 = vpack.c.bf16 %v99_v14, %v97_v11  ;;  %v103_v20 = vld [vmem:[#allocation10 + $0x78] sm:$0xff]  ;;  %v102_v29 = vld [vmem:[#allocation10 + $0x70] sm:$0xff]  ;;  %s621_s27 = sld [smem:[#allocation2 + $0x83]]  ;;  %s628_s28 = sld [smem:[#allocation2 + $0x100]]  ;;  %v84_v14 = vld [vmem:[#allocation11 + $0x8] sm:$0xff] }
  0x4f   :  { %v236_v18 = vstv %s928_s19  ;;  %v964_v27 = vpack.c.bf16 %v103_v20, %v101_v19  ;;  %v972_v32 = vpack.c.bf16 %v102_v29, %v100_v28  ;;  %v233_v34 = vstv %s618_s24  ;;  %s638_s29 = sld [smem:[#allocation2 + $0x180]]  ;;  %s630_s30 = sld [smem:[#allocation2 + $0x102]] }
  0x50   :  { %v237_v21 = vmul.f32 %v236_v18, %v943_v12  ;;  %v108_v22 = vstv %s930_s20  ;;  %v105_v35 = vstv %s104_s1  ;;  %v234_v36 = vmul.f32 %v233_v34, %v943_v12  ;;  %s640_s7 = sld [smem:[#allocation2 + $0x182]]  ;;  %s631_s8 = sld [smem:[#allocation2 + $0x103]] }
  0x51   :  { %v356_v23 = vstv %s932_s21  ;;  %v109_v24 = vmul.f32 %v108_v22, %v943_v12  ;;  %655 = vmatpush1.bf16.msra.mxu0 %v947_v13  ;;  %671 = vmatpush1.bf16.msra.mxu1 %v947_v13  ;;  %v244_v37 = vstv %s620_s25  ;;  %v106_v39 = vmul.f32 %v105_v35, %v943_v12  ;;  %s641_s9 = sld [smem:[#allocation2 + $0x183]]  ;;  %s130_s10 = sld [smem:[#allocation7]] }
  0x52   :  { %239 = vrot.lane.b32.xlu1 %v237_v21, %s839_s5  ;;  %v357_v26 = vmul.f32 %v356_v23, %v943_v12  ;;  %657 = vmatprep.subr.bf16.mxu0 %v951_v15  ;;  %v476_v30 = vstv %s936_s4  ;;  %v245_v44 = vmul.f32 %v244_v37, %v118_v38  ;;  %s614_s11 = sld [smem:[#allocation7 + $0x1]]  ;;  %s622_s12 = sld [smem:[#allocation7 + $0x80]]  ;;  %v85_v23 = vld [vmem:[#allocation11 + $0x10] sm:$0xff] }
  0x53   :  { %111 = vrot.lane.b32.xlu0 %v109_v24, %s839_s5  ;;  %673 = vmatprep.subr.bf16.mxu1 %v951_v15  ;;  %v477_v33 = vmul.f32 %v476_v30, %v943_v12  ;;  %v116_v41 = vstv %s612_s26  ;;  %v123_v47 = vstv %s613_s2  ;;  %s623_s13 = sld [smem:[#allocation7 + $0x81]]  ;;  %s615_s14 = sld [smem:[#allocation7 + $0x2]]  ;;  %v86_v30 = vld [vmem:[#allocation11 + $0x18] sm:$0xff] }
  0x54   :  { %v120_v45 = vmul.f32 %v118_v38, %v116_v41  ;;  %v248_v48 = vstv %s621_s27  ;;  %v353_v57 = vstv %s628_s28  ;;  %s624_s15 = sld [smem:[#allocation7 + $0x82]]  ;;  %s616_s16 = sld [smem:[#allocation7 + $0x3]] }
  0x55   :  { %659 = vmatpush1.bf16.msra.mxu0 %v960_v25  ;;  %675 = vmatpush1.bf16.msra.mxu1 %v960_v25  ;;  %v473_v58 = vstv %s638_s29  ;;  %v354_v59 = vmul.f32 %v353_v57, %v943_v12  ;;  %v364_v60 = vstv %s630_s30  ;;  %s625_s0 = sld [smem:[#allocation7 + $0x83]]  ;;  %s632_s17 = sld [smem:[#allocation7 + $0x100]] }
  0x56   :  { %359 = vrot.lane.b32.xlu1 %v357_v26, %s839_s5  ;;  %661 = vmatprep.subr.bf16.mxu0 %v964_v27  ;;  %v474_v61 = vmul.f32 %v473_v58, %v943_v12  ;;  %v484_v63 = vstv %s640_s7  ;;  %v365_v1 = vmul.f32 %v364_v60, %v118_v38  ;;  %s633_s3 = sld [smem:[#allocation7 + $0x101]]  ;;  %s642_s18 = sld [smem:[#allocation7 + $0x180]] }
  0x57   :  { %124 = vrot.lane.b32.xlu0 %v943_v12, %s839_s5  ;;  %677 = vmatprep.subr.bf16.mxu1 %v964_v27  ;;  %v485_v3 = vmul.f32 %v484_v63, %v118_v38  ;;  %v488_v6 = vstv %s641_s9  ;;  %s643_s19 = sld [smem:[#allocation7 + $0x181]]  ;;  %s634_s20 = sld [smem:[#allocation7 + $0x102]] }
  0x58   :  { %v134_v16 = vstv %s614_s11  ;;  %v252_v17 = vstv %s622_s12  ;;  %s644_s21 = sld [smem:[#allocation7 + $0x182]]  ;;  %s1005_s4 = sld [smem:[#allocation9]] }
  0x59   :  { %663 = vmatpush1.bf16.msra.mxu0 %v972_v32  ;;  %679 = vmatpush1.bf16.msra.mxu1 %v972_v32  ;;  %v255_v18 = vstv %s623_s13  ;;  %v135_v20 = vmul.f32 %v134_v16, %v84_v14  ;;  %v138_v24 = vstv %s615_s14  ;;  %s1007_s22 = sld [smem:[#allocation9 + $0x1]]  ;;  %s1009_s23 = sld [smem:[#allocation7 + $0x103]] }
  0x5a   :  { %681 = vmatprep.subr.bf16.mxu0 %v648_v2  ;;  %697 = vmatprep.subr.bf16.mxu1 %v648_v2  ;;  %v256_v22 = vmul.f32 %v255_v18, %v84_v14  ;;  %s637_s24 = sld [smem:[#allocation9 + $0x2]]  ;;  %s647_s1 = sld [smem:[#allocation9 + $0x3]] }
  0x5b   :  { %479 = vrot.lane.b32.xlu0 %v477_v33, %s839_s5  ;;  %s1011_s5 = sld [smem:[#allocation7 + $0x183]]  ;;  %s841_s25 = smov [#allocation13]  }
  0x5c   :  { %v492_v41 = vstv %s642_s18  ;;  %s598_s26 = sshll.u32 %s841_s25, 4  ;;  %s599_s26 = int_to_ptr.vmem [resolvable:$true] %s598_s26 }
  0x5d   :  { %s798_s2 = scalar_lea.vmem %s599_s26, 512  ;;  %p803_p0 = scmp.lt.s32.totalorder %s599_s26, %s599_s26 }
  0x5e   :  { %p799_p13 = scmp.ne.s32.totalorder %s599_s26, %s798_s2  ;;  %p804_p1 = scmp.lt.s32.totalorder %s798_s2, %s798_s2 }
  0x60   :  { %v464_v18 = vstv %s637_s24  ;;  %p805_p2 = por %p804_p1, %p803_p0 }
  0x62   :  { %p806_p3 = pnand %p805_p2, %p799_p13 }
  0xc4   :  { %v240_v40 = vpop.permute.xlu1 %239 }
  0xc5   :  { %v112_v42 = vpop.permute.xlu0 %111  ;;  %v242_v43 = vadd.f32 %v240_v40, %v234_v36  ;;  %v375_v40 = vstv %s633_s3 }
  0xc6   :  { %v114_v46 = vadd.f32 %v112_v42, %v106_v39  ;;  %v372_v39 = vstv %s632_s17  ;;  %v495_v42 = vstv %s643_s19 }
  0xc7   :  { %v246_v50 = vadd.f32 %v245_v44, %v242_v43  ;;  %v376_v44 = vmul.f32 %v375_v40, %v84_v14 }
  0xc8   :  { %v121_v52 = vadd.f32 %v120_v45, %v114_v46  ;;  %v360_v62 = vpop.permute.xlu1 %359 }
  0xc9   :  { %v125_v49 = vpop.permute.xlu0 %124  ;;  %v362_v2 = vadd.f32 %v360_v62, %v354_v59 }
  0xca   :  { %v126_v51 = vrot.slane %v125_v49, 4  ;;  %v496_v49 = vmul.f32 %v495_v42, %v84_v14 }
  0xcb   :  { %v366_v7 = vadd.f32 %v365_v1, %v362_v2 }
  0xcc   :  { %v128_v53 = vmul.f32 %v126_v51, %v123_v47  ;;  %v249_v54 = vmul.f32 %v248_v48, %v126_v51  ;;  %v489_v10 = vmul.f32 %v488_v6, %v126_v51  ;;  %v379_v47 = vstv %s634_s20 }
  0xcd   :  { %v480_v0 = vpop.permute.xlu0 %479  ;;  %v380_v60 = vmul.f32 %v379_v47, %v85_v23 }
  0xce   :  { %v129_v55 = vadd.f32 %v128_v53, %v121_v52  ;;  %v250_v56 = vadd.f32 %v249_v54, %v246_v50  ;;  %v482_v4 = vadd.f32 %v480_v0, %v474_v61  ;;  %v499_v50 = vstv %s644_s21 }
  0xcf   :  { %v224_v52 = vstv %s1005_s4  ;;  %v344_v54 = vstv %s1007_s22  ;;  %v500_v61 = vmul.f32 %v499_v50, %v85_v23  ;;  %v383_v0 = vstv %s1009_s23 }
  0xd0   :  { %617 = vmatmul.mubr.msk.f32.vlgmr.msra.gmra.mrb[0].mxu0 %vm148_vm0, %v129_v55  ;;  %626 = vmatmul.mubr.msk.f32.vlgmr.msra.gmra.mrb[0].mxu1 %vm148_vm0, %v250_v56 }
  0xd1   :  { %683 = vmatpush1.bf16.msra.mxu0 %v934_v5  ;;  %699 = vmatpush1.bf16.msra.mxu1 %v934_v5  ;;  %v368_v5 = vstv %s631_s8 }
  0xd2   :  { %685 = vmatprep.subr.bf16.mxu0 %v938_v9  ;;  %701 = vmatprep.subr.bf16.mxu1 %v938_v9  ;;  %v369_v8 = vmul.f32 %v368_v5, %v126_v51  ;;  %v486_v9 = vadd.f32 %v485_v3, %v482_v4  ;;  %v503_v4 = vstv %s1011_s5 }
  0xd3   :  { %456 = vmatprep.mubr.f32.mxu0 %v840_v31  ;;  %576 = vmatprep.mubr.f32.mxu1 %v840_v31  ;;  %v142_v31 = vstv %s616_s16 }
  0xd4   :  { %v370_v11 = vadd.f32 %v369_v8, %v366_v7  ;;  %v490_v12 = vadd.f32 %v489_v10, %v486_v9  ;;  %v143_v34 = vmul.f32 %v142_v31, %v86_v30  ;;  %v384_v8 = vmul.f32 %v383_v0, %v86_v30 }
  0xd5   :  { %687 = vmatpush1.bf16.msra.mxu0 %v947_v13  ;;  %703 = vmatpush1.bf16.msra.mxu1 %v947_v13  ;;  %v83_v13 = vld [vmem:[#allocation11] sm:$0xff] }
  0xd6   :  { %689 = vmatprep.subr.bf16.mxu0 %v951_v15  ;;  %705 = vmatprep.subr.bf16.mxu1 %v951_v15  ;;  %v131_v15 = vstv %s130_s10  ;;  %v253_v21 = vmul.f32 %v252_v17, %v83_v13  ;;  %v373_v43 = vmul.f32 %v372_v39, %v83_v13  ;;  %v493_v48 = vmul.f32 %v492_v41, %v83_v13 }
  0xd7   :  { %v132_v19 = vmul.f32 %v131_v15, %v83_v13 }
  0xd8   :  { %v257_v28 = vadd.f32 %v256_v22, %v253_v21  ;;  %v377_v55 = vadd.f32 %v376_v44, %v373_v43  ;;  %v497_v1 = vadd.f32 %v496_v49, %v493_v48 }
  0xd9   :  { %691 = vmatpush1.bf16.msra.mxu0 %v960_v25  ;;  %707 = vmatpush1.bf16.msra.mxu1 %v960_v25  ;;  %v259_v25 = vstv %s624_s15  ;;  %v136_v26 = vadd.f32 %v135_v20, %v132_v19  ;;  %v584_v20 = vstv %s647_s1 }
  0xda   :  { %693 = vmatprep.subr.bf16.mxu0 %v964_v27  ;;  %709 = vmatprep.subr.bf16.mxu1 %v964_v27  ;;  %v139_v27 = vmul.f32 %v138_v24, %v85_v23  ;;  %v260_v29 = vmul.f32 %v259_v25, %v85_v23  ;;  %v381_v7 = vadd.f32 %v380_v60, %v377_v55 }
  0xdc   :  { %v140_v33 = vadd.f32 %v139_v27, %v136_v26  ;;  %v261_v35 = vadd.f32 %v260_v29, %v257_v28  ;;  %v385_v13 = vadd.f32 %v384_v8, %v381_v7 }
  0xdd   :  { %695 = vmatpush1.bf16.msra.mxu0 %v972_v32  ;;  %711 = vmatpush1.bf16.msra.mxu1 %v972_v32  ;;  %v263_v32 = vstv %s625_s0 }
  0xde   :  { %v264_v36 = vmul.f32 %v263_v32, %v86_v30  ;;  %v144_v37 = vadd.f32 %v143_v34, %v140_v33  ;;  %v387_v15 = vcombine.high %v385_v13, %v385_v13 }
  0xe0   :  { %636 = vmatmul.mubr.msk.f32.vlgmr.msra.gmra.mrb[2].mxu0 %vm148_vm0, %v370_v11  ;;  %646 = vmatmul.mubr.msk.f32.vlgmr.msra.gmra.mrb[2].mxu1 %vm148_vm0, %v490_v12  ;;  %v265_v38 = vadd.f32 %v264_v36, %v261_v35  ;;  %v146_v45 = vcombine.high %v144_v37, %v144_v37  ;;  %v501_v11 = vadd.f32 %v500_v61, %v497_v1 }
  0xe1   :  { %v504_v12 = vmul.f32 %v503_v4, %v86_v30 }
  0xe2   :  { %v267_v46 = vcombine.high %v265_v38, %v265_v38 }
  0xe3   :  { %v505_v14 = vadd.f32 %v504_v12, %v501_v11 }
  0xe5   :  { %v507_v16 = vcombine.high %v505_v14, %v505_v14 }
 0x1a3   :  { %v218_v51 = vpop.f32.mrb[0].mxu0  ;;  %v338_v53 = vpop.f32.mrb[0].mxu1 }
 0x1a4   :  { %v219_v56 = vadd.f32 %v218_v51, %v144_v37  ;;  %v339_v57 = vadd.f32 %v338_v53, %v265_v38  ;;  %v220_v58 = vpop.f32.mrb[1].mxu0  ;;  %v340_v59 = vpop.f32.mrb[1].mxu1 }
 0x1a5   :  { %v221_v62 = vadd.f32 %v220_v58, %v146_v45  ;;  %v341_v63 = vadd.f32 %v340_v59, %v267_v46 }
 0x1a6   :  { %v225_v2 = vadd.f32 %v224_v52, %v219_v56  ;;  %v345_v3 = vadd.f32 %v344_v54, %v339_v57 }
 0x1a7   :  { %v226_v5 = vadd.f32 %v224_v52, %v221_v62  ;;  %v346_v6 = vadd.f32 %v344_v54, %v341_v63 }
 0x1a9   :  { %v229_v9 = vcombine.low %v225_v2, %v226_v5  ;;  %v349_v10 = vcombine.low %v345_v3, %v346_v6 }
 0x1ab   :  { %231 = vst [vmem:[#allocation13] sm:$0xff] %v229_v9  ;;  %351 = vst [vmem:[#allocation13 + $0x8] sm:$0xff] %v349_v10 }
 0x1b3   :  { %v458_v17 = vpop.f32.mrb[2].mxu0  ;;  %v578_v19 = vpop.f32.mrb[2].mxu1 }
 0x1b4   :  { %v459_v21 = vadd.f32 %v458_v17, %v385_v13  ;;  %v579_v22 = vadd.f32 %v578_v19, %v505_v14  ;;  %v460_v23 = vpop.f32.mrb[3].mxu0  ;;  %v580_v24 = vpop.f32.mrb[3].mxu1 }
 0x1b5   :  { %v461_v25 = vadd.f32 %v460_v23, %v387_v15  ;;  %v581_v26 = vadd.f32 %v580_v24, %v507_v16 }
 0x1b6   :  { %v465_v27 = vadd.f32 %v464_v18, %v459_v21  ;;  %v585_v28 = vadd.f32 %v584_v20, %v579_v22 }
 0x1b7   :  { %v466_v29 = vadd.f32 %v464_v18, %v461_v25  ;;  %v586_v30 = vadd.f32 %v584_v20, %v581_v26 }
 0x1b9   :  { %v469_v31 = vcombine.low %v465_v27, %v466_v29  ;;  %v589_v32 = vcombine.low %v585_v28, %v586_v30 }
 0x1bb   :  { %471 = vst [vmem:[#allocation13 + $0x10] sm:$0xff] %v469_v31  ;;  %591 = vst [vmem:[#allocation13 + $0x18] sm:$0xff] %v589_v32 }
 0x1bc   :  { %809 = shalt.err (!%p806_p3)
}
 0x1bd   :  { %s810_s29 = scalar_lea.hbm %s1035_s6, 512 }
 0x1be   :  { %p811_p4 = scmp.ne.s32.totalorder %s1035_s6, %s810_s29  ;;  %p814_p5 = scmp.lt.u32.totalorder %s810_s29, %s1035_s6 }
 0x1c0   :  { %p816_p6 = pnand %p814_p5, %p811_p4 }
 0x1c2   :  { %819 = shalt.err (!%p816_p6)
}
 0x1c3   :  { %601 = dma.vmem_to_hbm [thread:$0]  %s599_s26, 512, %s1035_s6, [#allocation4]  }
 0x1c4   :  { %830 = dma.done.wait [#allocation4], 512  }
 0x1c5   :  { %831 = vsyncadd [#allocation4], 4294966784 }
 0x1c6   :  { %605 = vsyncpa [#allocation3], 1 }
 0x1c7   :  { %606 = vsyncpa [#allocation12], 1 }
 0x1c8   :  { %607 = vsyncpa [#allocation4], 1 }
 0x1c9   :  { %608 = vsyncpa [#allocation5], 1 }
 0x1ca   :  { %609 = vsyncpa [#allocation8], 1 }
 0x1cb   :  { %610 = vsyncpa [#allocation6], 1 }

</bundles_post_ra>
